<compile_context>
chip_gen: v6e
topology: v6e:2x2x1
jax: 0.10.0
libtpu: 0.0.40
codegen_flags: <defaults>
</compile_context>

<pallas_src>
import jax
import jax.numpy as jnp
from jax.experimental import pallas as pl
from jax.experimental.pallas import tpu as pltpu

_SUB, _LANE = 8, 128          # one f32 vreg tile (sublane x lane)
_TILE = _SUB * _LANE          # 1024 slots


def _awl_kernel(consts_ref, loss_ref, out_ref):
    """consts_ref: (2, 8, 128) f32 — [0] = 0.5/p^2, [1] = log1p(p^2).
       loss_ref:   (8, 128)   f32 — losses (padded with 0).
       Padded lanes produce 0; the wrapper slices them off — never reduce
       over this tile directly."""
    out_ref[...] = consts_ref[0] * loss_ref[...] + consts_ref[1]


_awl_pallas = pl.pallas_call(
    _awl_kernel,
    out_shape=jax.ShapeDtypeStruct((_SUB, _LANE), jnp.float32),
    in_specs=[
        pl.BlockSpec(memory_space=pltpu.MemorySpace.VMEM),   # constants tile
        pl.BlockSpec(memory_space=pltpu.MemorySpace.VMEM),   # loss tile
    ],
    out_specs=pl.BlockSpec(memory_space=pltpu.MemorySpace.VMEM),
    compiler_params=pltpu.CompilerParams(
        # Let XLA fuse the pad/reshape producing the loss tile into the call.
        allow_input_fusion=[False, True],
    ),
    cost_estimate=pl.CostEstimate(
        flops=2 * _TILE,            # one FMA per lane
        transcendentals=0,          # all log/recip precomputed in the wrapper
        bytes_accessed=4 * _TILE * 4,
    ),
)


@jax.jit
def _awl_forward(const_tile: jax.Array, loss_dict: dict) -> dict:
    """const_tile: cached (2, 8, 128) f32. loss_dict: dict of scalar losses.
    Returns a dict (same keys) of weighted losses. Everything — packing,
    kernel, unpacking — runs inside this single compiled executable."""
    keys = sorted(loss_dict.keys())
    n = len(keys)
    losses = jnp.stack(
        [jnp.asarray(loss_dict[k], dtype=jnp.float32).reshape(()) for k in keys]
    )
    loss_tile = jnp.pad(losses, (0, _TILE - n)).reshape(_SUB, _LANE)
    out_tile = _awl_pallas(const_tile, loss_tile)
    out_vec = out_tile.reshape(-1)
    return {k: out_vec[i] for i, k in enumerate(keys)}


class AutomaticWeightedLoss:
    """JAX/Pallas port of the PyTorch AutomaticWeightedLoss (forward pass)."""

    def __init__(self, num: int = 21):
        assert num <= _TILE, "num must fit in one (8,128) tile"
        self.num = num
        # torch.ones(num, requires_grad=True) — deterministic init.
        # TODO(synk): forward-only port; params are not hooked into any
        # optimizer/grad path.  If self.params is updated externally, call
        # invalidate_params_cache() so the cached constants are rebuilt.
        self.params = jnp.ones((num,), dtype=jnp.float32)
        self.keys = None
        self._const_tile = None   # cached (2, 8, 128) [0.5/p^2, log1p(p^2)]

    def invalidate_params_cache(self):
        self._const_tile = None

    def _get_const_tile(self) -> jax.Array:
        if self._const_tile is None:
            p = self.params.astype(jnp.float32)
            p2 = p * p
            c1 = 0.5 / p2             # exact f32 (no approx vrcp error)
            c2 = jnp.log1p(p2)        # log1p for precision as p -> 0
            pad = _TILE - self.num
            c1 = jnp.pad(c1, (0, pad)).reshape(_SUB, _LANE)
            c2 = jnp.pad(c2, (0, pad)).reshape(_SUB, _LANE)
            self._const_tile = jnp.stack([c1, c2], axis=0)   # built once, cached
        return self._const_tile

    def __call__(self, loss_dict: dict) -> dict:
        if self.keys is None:
            self.keys = sorted(list(loss_dict.keys()))
        assert len(self.keys) <= self.num

        weighted = _awl_forward(
            self._get_const_tile(),
            {k: loss_dict[k] for k in self.keys},
        )
        # Return a new dict instead of mutating the caller's.
        out = dict(loss_dict)
        out.update(weighted)
        return out


if __name__ == "__main__":
    key = jax.random.PRNGKey(0)
    num_losses = 6
    loss_names = ["heatmap", "joint", "mesh", "normal", "pose", "shape"]
    loss_vals = jax.random.uniform(
        key, (num_losses,), dtype=jnp.float32, minval=0.1, maxval=3.0
    )
    loss_dict = {name: loss_vals[i] for i, name in enumerate(loss_names)}

    awl = AutomaticWeightedLoss(num=num_losses)
    out_dict = awl(dict(loss_dict))
    out_vals = jnp.stack([out_dict[k] for k in sorted(out_dict.keys())])
    jax.block_until_ready(out_vals)

    # Reference check (pure JAX) against the module formula.  The kernel path
    # is now exact f32 (no approx reciprocal), so use a tight tolerance.
    p = awl.params[:num_losses]
    ref_losses = jnp.stack([loss_dict[k] for k in sorted(loss_dict.keys())])
    ref = 0.5 / (p ** 2) * ref_losses + jnp.log(1.0 + p ** 2)
    assert jnp.allclose(out_vals, ref, rtol=1e-6, atol=1e-6), (out_vals, ref)

    print("KERNEL_OK")
</pallas_src>

<mosaic_0001>
module attributes {stable_mosaic.version = 11 : i64} {
  func.func @_awl_kernel(%arg0: memref<2x8x128xf32, #tpu.memory_space<vmem>>, %arg1: memref<8x128xf32, #tpu.memory_space<vmem>>, %arg2: memref<8x128xf32, #tpu.memory_space<vmem>>) attributes {dimension_semantics = [], scalar_prefetch = 0 : i64, scratch_operands = 0 : i64, tpu.core_type = #tpu.core_type<tc>} {
    %c0 = arith.constant 0 : index
    %c0_0 = arith.constant 0 : index
    %c0_1 = arith.constant 0 : index
    %0 = vector.load %arg0[%c0, %c0_0, %c0_1] : memref<2x8x128xf32, #tpu.memory_space<vmem>>, vector<1x8x128xf32>
    %1 = vector.shape_cast %0 : vector<1x8x128xf32> to vector<8x128xf32>
    %c0_2 = arith.constant 0 : index
    %c0_3 = arith.constant 0 : index
    %2 = vector.load %arg1[%c0_2, %c0_3] : memref<8x128xf32, #tpu.memory_space<vmem>>, vector<8x128xf32>
    %3 = arith.mulf %1, %2 : vector<8x128xf32>
    %c1 = arith.constant 1 : index
    %c0_4 = arith.constant 0 : index
    %c0_5 = arith.constant 0 : index
    %4 = vector.load %arg0[%c1, %c0_4, %c0_5] : memref<2x8x128xf32, #tpu.memory_space<vmem>>, vector<1x8x128xf32>
    %5 = vector.shape_cast %4 : vector<1x8x128xf32> to vector<8x128xf32>
    %6 = arith.addf %3, %5 : vector<8x128xf32>
    %c0_6 = arith.constant 0 : index
    %c0_7 = arith.constant 0 : index
    %7 = vector.load %arg2[%c0_6, %c0_7] : memref<8x128xf32, #tpu.memory_space<vmem>>, vector<8x128xf32>
    tpu.vector_store %arg2[%c0_6, %c0_7], %6 {strides = array<i32>} : memref<8x128xf32, #tpu.memory_space<vmem>>, vector<8x128xf32>,
    return
  }
}

</mosaic_0001>

<bundles_post_ra>
// kernel: _awl_forward.2
= control target key start
LH: loop header
LB: loop body
LE: loop exit
PB: predicated region body
PF: predicated region fallthrough
CT: control target
= control target key end

     0   :  { %v14_v2 = vlaneseq  ;;  %s68_s0 = inlined_call_operand.vmem [shape: f32[2,8,128], index: 0, kind: input, shape index: {}]   ;;  %s69_s1 = inlined_call_operand.vmem [shape: f32[6], index: 1, kind: input, shape index: {}]   ;;  %s70_s2 = inlined_call_operand.<no memory space> [shape: f32[], index: 2, kind: input, shape index: {}]   ;;  %s71_s3 = inlined_call_operand.vmem [shape: f32[8,128], index: 3, kind: output, shape index: {}]  }
   0x1   :  { %v8_v0 = vstv %s70_s2  ;;  %v13_v1 = vld [vmem:[%s69_s1] sm:$0x1]  ;;  %v32_v5 = vld [vmem:[%s68_s0 + $0x8] sm:$0xff] }
   0x2   :  { %v21_v3 = vld [vmem:[%s68_s0] sm:$0xff]  ;;  %vm16_vm0 = vcmp.lt.s32.totalorder %v14_v2, 6 }
   0x3   :  { %v17_v4 = vsel %vm16_vm0, %v13_v1, %v8_v0 }
   0x4   :  { %v23_v6 = vmul.f32 %v21_v3, %v17_v4 }
   0x6   :  { %v26_v7 = vadd.f32 %v32_v5, %v23_v6 }
   0x8   :  { %27 = vst [vmem:[%s71_s3] sm:$0xff] %v26_v7 }

</bundles_post_ra>
